<compile_context>
chip_gen: v6e
topology: v6e:2x2x1
jax: 0.10.0
libtpu: 0.0.40
codegen_flags: <defaults>
</compile_context>

<pallas_src>
import math
import functools

import jax
import jax.numpy as jnp
from jax.experimental import pallas as pl
from jax.experimental.pallas import tpu as pltpu

_BN_EPS = 1e-5

# Tap order matches the PyTorch 3x3 kernel flattened as (kh, kw): tap 4 = center.
_TAPS = tuple((dh, dw) for dh in (-1, 0, 1) for dw in (-1, 0, 1))


def _gelu_tanh(x):
    # TODO(synk): PyTorch F.gelu defaults to the exact erf formulation; erf has
    # no guaranteed Mosaic lowering, so the tanh approximation (max abs diff
    # ~1e-3) is used both in-kernel and in the in-script reference.
    c = math.sqrt(2.0 / math.pi)
    return 0.5 * x * (1.0 + jnp.tanh(c * (x + 0.044715 * x * x * x)))


def _normal_block2_kernel(x_ref, p1_ref, b2_ref, planes_ref, o_ref, *, B, C, W, HW):
    """Fused normal_block2 forward for B batch elements.

    x_ref:      (B, C, HW)      NCHW input, spatially flattened (lane dim = HW)
    p1_ref:     (C, C+1)        [w1_eff | b1_eff]   (conv1 + BN1 folded)
    b2_ref:     (B*C, 1)        folded conv2 bias + BN2 shift, tiled over B
    planes_ref: (9, B*C, HW)    per-tap (depthwise weight * 'same' border mask)
    o_ref:      (B, C, HW)      output
    """
    x = x_ref[...]                                   # (B, C, HW) f32
    p1 = p1_ref[...]                                 # (C, C+1)
    w1 = p1[:, :C]                                   # (C, C)
    b1 = p1[:, C:C + 1]                              # (C, 1)

    # ---- 1x1 conv (+BN1): one tiny MXU matmul per batch slice, then GELU ----
    # (MXU is ~0.1% utilized at C=4; keep it simple and amortize via fewer,
    #  larger grid steps rather than restructuring for the MXU.)
    ys = [jnp.dot(w1, x[b], preferred_element_type=jnp.float32) + b1
          for b in range(B)]
    y1 = jnp.concatenate(ys, axis=0) if B > 1 else ys[0]   # (B*C, HW)
    a = _gelu_tanh(y1)

    x_flat = x.reshape(B * C, HW)                    # sublane-only reshape

    # ---- depthwise 3x3 'same' conv (+BN2): center-tap init + 8 XLU rolls ----
    # shifted[:, p] = a[:, (p + off) mod HW]; out-of-image (and wrapped)
    # positions are zeroed because the weight planes already carry the border
    # masks.  pltpu.roll keeps the shifts on the XLU (idle slot here).
    acc = a * planes_ref[4]                          # center tap (mask == 1)
    for tap, (dh, dw) in enumerate(_TAPS):
        if dh == 0 and dw == 0:
            continue
        off = dh * W + dw
        shifted = pltpu.roll(a, (-off) % HW, axis=1)
        acc = acc + shifted * planes_ref[tap]

    # ---- bias, residual add, final GELU ------------------------------------
    out = _gelu_tanh(acc + b2_ref[...] + x_flat)
    o_ref[...] = out.reshape(B, C, HW).astype(o_ref.dtype)


def _pick_batch_block(N, C, HW):
    """Largest B | N with B*C a multiple of 8 (full f32 sublanes), VMEM-capped."""
    for B in range(N, 0, -1):
        if N % B == 0 and (B * C) % 8 == 0 and B * C * HW * 4 <= (4 << 20):
            return B
    return 1


def normal_block2_forward(x, params):
    """normal_block2 forward.  x: (N, C, H, W) f32.  Inference-mode BatchNorm."""
    N, C, H, W = x.shape
    HW = H * W
    B = _pick_batch_block(N, C, HW)
    grid_n = N // B

    w1 = params["conv1_w"].reshape(C, C)             # (C, C, 1, 1) -> (C, C)
    b1 = params["conv1_b"]                           # (C,)
    w2 = params["conv2_w"].reshape(C, 9)             # (C, 1, 3, 3) -> (C, 9)
    b2 = params["conv2_b"]                           # (C,)

    # Fold inference-mode BatchNorm into the convolutions (tiny plain-JAX setup).
    s1 = params["bn1_gamma"] / jnp.sqrt(params["bn1_var"] + _BN_EPS)
    t1 = params["bn1_beta"] - s1 * params["bn1_mean"]
    s2 = params["bn2_gamma"] / jnp.sqrt(params["bn2_var"] + _BN_EPS)
    t2 = params["bn2_beta"] - s2 * params["bn2_mean"]

    w1_eff = s1[:, None] * w1                        # (C, C)
    b1_eff = s1 * b1 + t1                            # (C,)
    w2_eff = s2[:, None] * w2                        # (C, 9)
    b2_eff = s2 * b2 + t2                            # (C,)

    p1 = jnp.concatenate([w1_eff, b1_eff[:, None]], axis=1)   # (C, C+1)
    b2t = jnp.tile(b2_eff[:, None], (B, 1))                    # (B*C, 1)

    # Precompute masked per-channel weight planes: plane[tap] already contains
    # (depthwise tap weight) x ('same'-padding border mask), tiled over B so it
    # lines up with the (B*C, HW) flattened activation rows.
    h_idx = jnp.arange(HW, dtype=jnp.int32) // W
    w_idx = jnp.arange(HW, dtype=jnp.int32) % W
    planes = []
    for tap, (dh, dw) in enumerate(_TAPS):
        valid = ((h_idx + dh >= 0) & (h_idx + dh < H) &
                 (w_idx + dw >= 0) & (w_idx + dw < W)).astype(jnp.float32)
        w_col = jnp.tile(w2_eff[:, tap:tap + 1], (B, 1))       # (B*C, 1)
        planes.append(w_col * valid[None, :])                  # (B*C, HW)
    planes = jnp.stack(planes, axis=0)                         # (9, B*C, HW)

    x_flat = x.reshape(N, C, HW)                     # free reshape, stays NCHW

    kernel = functools.partial(_normal_block2_kernel, B=B, C=C, W=W, HW=HW)
    out_flat = pl.pallas_call(
        kernel,
        out_shape=jax.ShapeDtypeStruct((N, C, HW), x.dtype),
        grid_spec=pltpu.PrefetchScalarGridSpec(
            num_scalar_prefetch=0,
            grid=(grid_n,),
            in_specs=[
                pl.BlockSpec((B, C, HW), lambda n: (n, 0, 0)),       # activations
                pl.BlockSpec((C, C + 1), lambda n: (0, 0)),          # conv1+BN1
                pl.BlockSpec((B * C, 1), lambda n: (0, 0)),          # conv2 bias
                pl.BlockSpec((9, B * C, HW), lambda n: (0, 0, 0)),   # tap planes
            ],
            out_specs=pl.BlockSpec((B, C, HW), lambda n: (n, 0, 0)),
        ),
        compiler_params=pltpu.CompilerParams(
            # Shard over the two v7x TensorCores only when there are >=2 steps.
            dimension_semantics=("parallel",) if grid_n > 1 else ("arbitrary",),
            vmem_limit_bytes=32 * 1024 * 1024,
        ),
    )(x_flat, p1, b2t, planes)

    return out_flat.reshape(N, C, H, W)


# ---------------------------------------------------------------------------
# Pure-JAX reference (same inference-mode BN + tanh GELU) for a sanity check.
# ---------------------------------------------------------------------------
def _reference(x, params):
    C = x.shape[1]

    def bn(y, g, b, mean, var):
        return (g[None, :, None, None] * (y - mean[None, :, None, None])
                / jnp.sqrt(var[None, :, None, None] + _BN_EPS)
                + b[None, :, None, None])

    y1 = jax.lax.conv_general_dilated(
        x, params["conv1_w"], (1, 1), "VALID",
        dimension_numbers=("NCHW", "OIHW", "NCHW"))
    y1 = y1 + params["conv1_b"][None, :, None, None]
    a = _gelu_tanh(bn(y1, params["bn1_gamma"], params["bn1_beta"],
                      params["bn1_mean"], params["bn1_var"]))

    y2 = jax.lax.conv_general_dilated(
        a, params["conv2_w"], (1, 1), [(1, 1), (1, 1)],
        feature_group_count=C,
        dimension_numbers=("NCHW", "OIHW", "NCHW"))
    y2 = y2 + params["conv2_b"][None, :, None, None]
    z = bn(y2, params["bn2_gamma"], params["bn2_beta"],
           params["bn2_mean"], params["bn2_var"]) + x
    return _gelu_tanh(z)


if __name__ == "__main__":
    key = jax.random.PRNGKey(0)
    ks = jax.random.split(key, 11)

    N, C, H, W = 2, 4, 16, 16
    x = jax.random.normal(ks[0], (N, C, H, W), dtype=jnp.float32)

    def uinit(k, shape, fan_in):
        bound = 1.0 / math.sqrt(fan_in)
        return jax.random.uniform(k, shape, minval=-bound, maxval=bound,
                                  dtype=jnp.float32)

    params = {
        # conv1: 1x1, C -> C (kaiming_uniform-style bound, deterministic)
        "conv1_w": uinit(ks[1], (C, C, 1, 1), C),
        "conv1_b": uinit(ks[2], (C,), C),
        # conv2: 3x3 depthwise (groups = C)
        "conv2_w": uinit(ks[3], (C, 1, 3, 3), 9),
        "conv2_b": uinit(ks[4], (C,), 9),
        # BatchNorm (inference mode: affine + running stats)
        "bn1_gamma": 1.0 + 0.1 * jax.random.normal(ks[5], (C,), jnp.float32),
        "bn1_beta": 0.1 * jax.random.normal(ks[6], (C,), jnp.float32),
        "bn1_mean": 0.1 * jax.random.normal(ks[7], (C,), jnp.float32),
        "bn1_var": jax.random.uniform(ks[8], (C,), minval=0.5, maxval=1.5,
                                      dtype=jnp.float32),
        "bn2_gamma": 1.0 + 0.1 * jax.random.normal(ks[9], (C,), jnp.float32),
        "bn2_beta": 0.1 * jax.random.normal(ks[10], (C,), jnp.float32),
        "bn2_mean": jnp.zeros((C,), jnp.float32),
        "bn2_var": jnp.ones((C,), jnp.float32),
    }

    y = normal_block2_forward(x, params)
    y = jax.block_until_ready(y)

    y_ref = _reference(x, params)
    assert y.shape == (N, C, H, W)
    err = float(jnp.max(jnp.abs(y - y_ref)))
    assert jnp.allclose(y, y_ref, atol=1e-4, rtol=1e-4), err
    print("KERNEL_OK")
</pallas_src>

<mosaic_0001>
module attributes {stable_mosaic.version = 11 : i64} {
  func.func @_normal_block2_kernel(%arg0: i32, %arg1: memref<2x4x256xf32, #tpu.memory_space<vmem>>, %arg2: memref<4x5xf32, #tpu.memory_space<vmem>>, %arg3: memref<8x1xf32, #tpu.memory_space<vmem>>, %arg4: memref<9x8x256xf32, #tpu.memory_space<vmem>>, %arg5: memref<2x4x256xf32, #tpu.memory_space<vmem>>) attributes {dimension_semantics = [#tpu.dimension_semantics<arbitrary>], iteration_bounds = array<i64: 1>, scalar_prefetch = 0 : i64, scratch_operands = 0 : i64, tpu.core_type = #tpu.core_type<tc>, window_params = [{transform_indices = @transform_0, window_bounds = array<i64: 2, 4, 256>}, {pipeline_mode = #tpu.pipeline_mode<synchronous>, transform_indices = @transform_1, window_bounds = array<i64: 4, 5>}, {pipeline_mode = #tpu.pipeline_mode<synchronous>, transform_indices = @transform_2, window_bounds = array<i64: 8, 1>}, {pipeline_mode = #tpu.pipeline_mode<synchronous>, transform_indices = @transform_3, window_bounds = array<i64: 9, 8, 256>}, {transform_indices = @transform_4, window_bounds = array<i64: 2, 4, 256>}]} {
    %c0 = arith.constant 0 : index
    %c0_0 = arith.constant 0 : index
    %c0_1 = arith.constant 0 : index
    %0 = vector.load %arg1[%c0, %c0_0, %c0_1] : memref<2x4x256xf32, #tpu.memory_space<vmem>>, vector<2x4x256xf32>
    %c0_2 = arith.constant 0 : index
    %c0_3 = arith.constant 0 : index
    %1 = vector.load %arg2[%c0_2, %c0_3] : memref<4x5xf32, #tpu.memory_space<vmem>>, vector<4x5xf32>
    %2 = vector.extract_strided_slice %1 {offsets = [0, 0], sizes = [4, 4], strides = [1, 1]} : vector<4x5xf32> to vector<4x4xf32>
    %3 = vector.extract_strided_slice %1 {offsets = [0, 4], sizes = [4, 1], strides = [1, 1]} : vector<4x5xf32> to vector<4x1xf32>
    %4 = vector.extract_strided_slice %0 {offsets = [0, 0, 0], sizes = [1, 4, 256], strides = [1, 1, 1]} : vector<2x4x256xf32> to vector<1x4x256xf32>
    %5 = vector.shape_cast %4 : vector<1x4x256xf32> to vector<4x256xf32>
    %cst = arith.constant dense<0.000000e+00> : vector<4x256xf32>
    %6 = tpu.matmul %2, %5, %cst {dimension_numbers = #tpu.dot_dimension_numbers<[1], [0], [0], [1], [0, 0, 1, 1], [], []>} : vector<4x4xf32>, vector<4x256xf32>, vector<4x256xf32> -> vector<4x256xf32>
    %7 = vector.broadcast %3 : vector<4x1xf32> to vector<4x256xf32>
    %8 = arith.addf %6, %7 : vector<4x256xf32>
    %9 = vector.extract_strided_slice %0 {offsets = [1, 0, 0], sizes = [1, 4, 256], strides = [1, 1, 1]} : vector<2x4x256xf32> to vector<1x4x256xf32>
    %10 = vector.shape_cast %9 : vector<1x4x256xf32> to vector<4x256xf32>
    %cst_4 = arith.constant dense<0.000000e+00> : vector<4x256xf32>
    %11 = tpu.matmul %2, %10, %cst_4 {dimension_numbers = #tpu.dot_dimension_numbers<[1], [0], [0], [1], [0, 0, 1, 1], [], []>} : vector<4x4xf32>, vector<4x256xf32>, vector<4x256xf32> -> vector<4x256xf32>
    %12 = vector.broadcast %3 : vector<4x1xf32> to vector<4x256xf32>
    %13 = arith.addf %11, %12 : vector<4x256xf32>
    %14 = tpu.concatenate %8, %13 in 0 : vector<4x256xf32>, vector<4x256xf32> -> vector<8x256xf32>
    %cst_5 = arith.constant 5.000000e-01 : f32
    %15 = vector.broadcast %cst_5 : f32 to vector<8x256xf32>
    %16 = arith.mulf %15, %14 : vector<8x256xf32>
    %cst_6 = arith.constant 4.471500e-02 : f32
    %17 = vector.broadcast %cst_6 : f32 to vector<8x256xf32>
    %18 = arith.mulf %17, %14 : vector<8x256xf32>
    %19 = arith.mulf %18, %14 : vector<8x256xf32>
    %20 = arith.mulf %19, %14 : vector<8x256xf32>
    %21 = arith.addf %14, %20 : vector<8x256xf32>
    %cst_7 = arith.constant 0.797884583 : f32
    %22 = vector.broadcast %cst_7 : f32 to vector<8x256xf32>
    %23 = arith.mulf %22, %21 : vector<8x256xf32>
    %24 = math.tanh %23 : vector<8x256xf32>
    %cst_8 = arith.constant 1.000000e+00 : f32
    %25 = vector.broadcast %cst_8 : f32 to vector<8x256xf32>
    %26 = arith.addf %25, %24 : vector<8x256xf32>
    %27 = arith.mulf %16, %26 : vector<8x256xf32>
    %28 = vector.shape_cast %0 : vector<2x4x256xf32> to vector<8x256xf32>
    %c4 = arith.constant 4 : index
    %c0_9 = arith.constant 0 : index
    %c0_10 = arith.constant 0 : index
    %29 = vector.load %arg4[%c4, %c0_9, %c0_10] : memref<9x8x256xf32, #tpu.memory_space<vmem>>, vector<1x8x256xf32>
    %30 = vector.shape_cast %29 : vector<1x8x256xf32> to vector<8x256xf32>
    %31 = arith.mulf %27, %30 : vector<8x256xf32>
    %c17_i32 = arith.constant 17 : i32
    %32 = tpu.dynamic_rotate %27 by %c17_i32 dim 1 : vector<8x256xf32>, i32 -> vector<8x256xf32>
    %c0_11 = arith.constant 0 : index
    %c0_12 = arith.constant 0 : index
    %c0_13 = arith.constant 0 : index
    %33 = vector.load %arg4[%c0_11, %c0_12, %c0_13] : memref<9x8x256xf32, #tpu.memory_space<vmem>>, vector<1x8x256xf32>
    %34 = vector.shape_cast %33 : vector<1x8x256xf32> to vector<8x256xf32>
    %35 = arith.mulf %32, %34 : vector<8x256xf32>
    %36 = arith.addf %31, %35 : vector<8x256xf32>
    %c16_i32 = arith.constant 16 : i32
    %37 = tpu.dynamic_rotate %27 by %c16_i32 dim 1 : vector<8x256xf32>, i32 -> vector<8x256xf32>
    %c1 = arith.constant 1 : index
    %c0_14 = arith.constant 0 : index
    %c0_15 = arith.constant 0 : index
    %38 = vector.load %arg4[%c1, %c0_14, %c0_15] : memref<9x8x256xf32, #tpu.memory_space<vmem>>, vector<1x8x256xf32>
    %39 = vector.shape_cast %38 : vector<1x8x256xf32> to vector<8x256xf32>
    %40 = arith.mulf %37, %39 : vector<8x256xf32>
    %41 = arith.addf %36, %40 : vector<8x256xf32>
    %c15_i32 = arith.constant 15 : i32
    %42 = tpu.dynamic_rotate %27 by %c15_i32 dim 1 : vector<8x256xf32>, i32 -> vector<8x256xf32>
    %c2 = arith.constant 2 : index
    %c0_16 = arith.constant 0 : index
    %c0_17 = arith.constant 0 : index
    %43 = vector.load %arg4[%c2, %c0_16, %c0_17] : memref<9x8x256xf32, #tpu.memory_space<vmem>>, vector<1x8x256xf32>
    %44 = vector.shape_cast %43 : vector<1x8x256xf32> to vector<8x256xf32>
    %45 = arith.mulf %42, %44 : vector<8x256xf32>
    %46 = arith.addf %41, %45 : vector<8x256xf32>
    %c1_i32 = arith.constant 1 : i32
    %47 = tpu.dynamic_rotate %27 by %c1_i32 dim 1 : vector<8x256xf32>, i32 -> vector<8x256xf32>
    %c3 = arith.constant 3 : index
    %c0_18 = arith.constant 0 : index
    %c0_19 = arith.constant 0 : index
    %48 = vector.load %arg4[%c3, %c0_18, %c0_19] : memref<9x8x256xf32, #tpu.memory_space<vmem>>, vector<1x8x256xf32>
    %49 = vector.shape_cast %48 : vector<1x8x256xf32> to vector<8x256xf32>
    %50 = arith.mulf %47, %49 : vector<8x256xf32>
    %51 = arith.addf %46, %50 : vector<8x256xf32>
    %c255_i32 = arith.constant 255 : i32
    %52 = tpu.dynamic_rotate %27 by %c255_i32 dim 1 : vector<8x256xf32>, i32 -> vector<8x256xf32>
    %c5 = arith.constant 5 : index
    %c0_20 = arith.constant 0 : index
    %c0_21 = arith.constant 0 : index
    %53 = vector.load %arg4[%c5, %c0_20, %c0_21] : memref<9x8x256xf32, #tpu.memory_space<vmem>>, vector<1x8x256xf32>
    %54 = vector.shape_cast %53 : vector<1x8x256xf32> to vector<8x256xf32>
    %55 = arith.mulf %52, %54 : vector<8x256xf32>
    %56 = arith.addf %51, %55 : vector<8x256xf32>
    %c241_i32 = arith.constant 241 : i32
    %57 = tpu.dynamic_rotate %27 by %c241_i32 dim 1 : vector<8x256xf32>, i32 -> vector<8x256xf32>
    %c6 = arith.constant 6 : index
    %c0_22 = arith.constant 0 : index
    %c0_23 = arith.constant 0 : index
    %58 = vector.load %arg4[%c6, %c0_22, %c0_23] : memref<9x8x256xf32, #tpu.memory_space<vmem>>, vector<1x8x256xf32>
    %59 = vector.shape_cast %58 : vector<1x8x256xf32> to vector<8x256xf32>
    %60 = arith.mulf %57, %59 : vector<8x256xf32>
    %61 = arith.addf %56, %60 : vector<8x256xf32>
    %c240_i32 = arith.constant 240 : i32
    %62 = tpu.dynamic_rotate %27 by %c240_i32 dim 1 : vector<8x256xf32>, i32 -> vector<8x256xf32>
    %c7 = arith.constant 7 : index
    %c0_24 = arith.constant 0 : index
    %c0_25 = arith.constant 0 : index
    %63 = vector.load %arg4[%c7, %c0_24, %c0_25] : memref<9x8x256xf32, #tpu.memory_space<vmem>>, vector<1x8x256xf32>
    %64 = vector.shape_cast %63 : vector<1x8x256xf32> to vector<8x256xf32>
    %65 = arith.mulf %62, %64 : vector<8x256xf32>
    %66 = arith.addf %61, %65 : vector<8x256xf32>
    %c239_i32 = arith.constant 239 : i32
    %67 = tpu.dynamic_rotate %27 by %c239_i32 dim 1 : vector<8x256xf32>, i32 -> vector<8x256xf32>
    %c8 = arith.constant 8 : index
    %c0_26 = arith.constant 0 : index
    %c0_27 = arith.constant 0 : index
    %68 = vector.load %arg4[%c8, %c0_26, %c0_27] : memref<9x8x256xf32, #tpu.memory_space<vmem>>, vector<1x8x256xf32>
    %69 = vector.shape_cast %68 : vector<1x8x256xf32> to vector<8x256xf32>
    %70 = arith.mulf %67, %69 : vector<8x256xf32>
    %71 = arith.addf %66, %70 : vector<8x256xf32>
    %c0_28 = arith.constant 0 : index
    %c0_29 = arith.constant 0 : index
    %72 = vector.load %arg3[%c0_28, %c0_29] : memref<8x1xf32, #tpu.memory_space<vmem>>, vector<8x1xf32>
    %73 = vector.broadcast %72 : vector<8x1xf32> to vector<8x256xf32>
    %74 = arith.addf %71, %73 : vector<8x256xf32>
    %75 = arith.addf %74, %28 : vector<8x256xf32>
    %cst_30 = arith.constant 5.000000e-01 : f32
    %76 = vector.broadcast %cst_30 : f32 to vector<8x256xf32>
    %77 = arith.mulf %76, %75 : vector<8x256xf32>
    %cst_31 = arith.constant 4.471500e-02 : f32
    %78 = vector.broadcast %cst_31 : f32 to vector<8x256xf32>
    %79 = arith.mulf %78, %75 : vector<8x256xf32>
    %80 = arith.mulf %79, %75 : vector<8x256xf32>
    %81 = arith.mulf %80, %75 : vector<8x256xf32>
    %82 = arith.addf %75, %81 : vector<8x256xf32>
    %cst_32 = arith.constant 0.797884583 : f32
    %83 = vector.broadcast %cst_32 : f32 to vector<8x256xf32>
    %84 = arith.mulf %83, %82 : vector<8x256xf32>
    %85 = math.tanh %84 : vector<8x256xf32>
    %cst_33 = arith.constant 1.000000e+00 : f32
    %86 = vector.broadcast %cst_33 : f32 to vector<8x256xf32>
    %87 = arith.addf %86, %85 : vector<8x256xf32>
    %88 = arith.mulf %77, %87 : vector<8x256xf32>
    %89 = vector.shape_cast %88 : vector<8x256xf32> to vector<2x4x256xf32>
    %c0_34 = arith.constant 0 : index
    %c0_35 = arith.constant 0 : index
    %c0_36 = arith.constant 0 : index
    %90 = vector.load %arg5[%c0_34, %c0_35, %c0_36] : memref<2x4x256xf32, #tpu.memory_space<vmem>>, vector<2x4x256xf32>
    tpu.vector_store %arg5[%c0_34, %c0_35, %c0_36], %89 {strides = array<i32>} : memref<2x4x256xf32, #tpu.memory_space<vmem>>, vector<2x4x256xf32>,
    return
  }
  func.func @transform_0(%arg0: i32) -> (i32, i32, i32) {
    %c0_i32 = arith.constant 0 : i32
    %c0_i32_0 = arith.constant 0 : i32
    %c0_i32_1 = arith.constant 0 : i32
    return %arg0, %c0_i32, %c0_i32_0 : i32, i32, i32
  }
  func.func @transform_1(%arg0: i32) -> (i32, i32) {
    %c0_i32 = arith.constant 0 : i32
    %c0_i32_0 = arith.constant 0 : i32
    %c0_i32_1 = arith.constant 0 : i32
    return %c0_i32, %c0_i32_0 : i32, i32
  }
  func.func @transform_2(%arg0: i32) -> (i32, i32) {
    %c0_i32 = arith.constant 0 : i32
    %c0_i32_0 = arith.constant 0 : i32
    %c0_i32_1 = arith.constant 0 : i32
    return %c0_i32, %c0_i32_0 : i32, i32
  }
  func.func @transform_3(%arg0: i32) -> (i32, i32, i32) {
    %c0_i32 = arith.constant 0 : i32
    %c0_i32_0 = arith.constant 0 : i32
    %c0_i32_1 = arith.constant 0 : i32
    %c0_i32_2 = arith.constant 0 : i32
    return %c0_i32, %c0_i32_0, %c0_i32_1 : i32, i32, i32
  }
  func.func @transform_4(%arg0: i32) -> (i32, i32, i32) {
    %c0_i32 = arith.constant 0 : i32
    %c0_i32_0 = arith.constant 0 : i32
    %c0_i32_1 = arith.constant 0 : i32
    return %arg0, %c0_i32, %c0_i32_0 : i32, i32, i32
  }
}

</mosaic_0001>

<bundles_post_ra>
// kernel: tpu_custom_call.1
= control target key start
LH: loop header
LB: loop body
LE: loop exit
PB: predicated region body
PF: predicated region fallthrough
CT: control target
= control target key end

     0   :  { %9 = vsyncpa [#allocation3], 0  ;;  %s626_s0 = inlined_call_operand.hbm [shape: f32[2,4,256], index: 0, kind: input, shape index: {}]   ;;  %s627_s1 = inlined_call_operand.vmem [shape: f32[4,5], index: 1, kind: input, shape index: {}]   ;;  %s628_s2 = inlined_call_operand.vmem [shape: f32[8,1], index: 2, kind: input, shape index: {}]   ;;  %s629_s3 = inlined_call_operand.hbm [shape: f32[9,8,256], index: 3, kind: input, shape index: {}]   ;;  %s630_s4 = inlined_call_operand.hbm [shape: f32[2,4,256], index: 4, kind: output, shape index: {}]  }
   0x1   :  { %10 = vsyncpa [#allocation6], 0 }
   0x2   :  { %11 = vsyncpa [#allocation4], 0  ;;  %s518_s15 = smov [#allocation2]  }
   0x3   :  { %s17_s16 = sshll.u32 %s518_s15, 4  ;;  %s18_s16 = int_to_ptr.vmem [resolvable:$true] %s17_s16 }
   0x4   :  { %s460_s17 = scalar_lea.vmem %s18_s16, 256  ;;  %p465_p1 = scmp.lt.s32.totalorder %s18_s16, %s18_s16 }
   0x5   :  { %p461_p0 = scmp.ne.s32.totalorder %s18_s16, %s460_s17  ;;  %p466_p2 = scmp.lt.s32.totalorder %s460_s17, %s460_s17 }
   0x7   :  { %p467_p3 = por %p466_p2, %p465_p1 }
   0x9   :  { %p468_p4 = pnand %p467_p3, %p461_p0 }
   0xb   :  { %471 = shalt.err (!%p468_p4)
}
   0xc   :  { %s519_s18 = smov 128   ;;  %s520_s19 = smov 8  }
   0xd   :  { %23 = dma.hbm_to_vmem [thread:$0]  %s626_s0, 256, %s18_s16, [#allocation3], %s519_s18, %s519_s18, %s520_s19  }
   0xe   :  { %s521_s22 = smov [#allocation5]  }
   0xf   :  { %s33_s23 = sshll.u32 %s521_s22, 4  ;;  %s34_s23 = int_to_ptr.vmem [resolvable:$true] %s33_s23 }
  0x10   :  { %s480_s24 = scalar_lea.vmem %s34_s23, 2304  ;;  %p485_p6 = scmp.lt.s32.totalorder %s34_s23, %s34_s23 }
  0x11   :  { %p481_p5 = scmp.ne.s32.totalorder %s34_s23, %s480_s24  ;;  %p486_p7 = scmp.lt.s32.totalorder %s480_s24, %s480_s24 }
  0x13   :  { %p487_p8 = por %p486_p7, %p485_p6 }
  0x15   :  { %p488_p9 = pnand %p487_p8, %p481_p5 }
  0x17   :  { %491 = shalt.err (!%p488_p9)
}
  0x18   :  { %s522_s25 = smov 256   ;;  %s523_s26 = smov 16  }
  0x19   :  { %39 = dma.hbm_to_vmem [thread:$0]  %s629_s3, 2304, %s34_s23, [#allocation6], %s522_s25, %s522_s25, %s523_s26  }
  0x1a   :  { %512 = dma.done.wait [#allocation3], 256  }
  0x1b   :  { %513 = vsyncadd [#allocation3], 4294967040 }
  0x1c   :  { %514 = dma.done.wait [#allocation6], 2304  }
  0x1d   :  { %515 = vsyncadd [#allocation6], 4294964992  ;;  %v524_v0 = vmov 0.0   ;;  %v525_v1 = vmov 4   ;;  %v570_v2 = vld [vmem:[#allocation2] sm:$0xff]  ;;  %vm59_vm0 = vcmask 1043456   ;;  %v247_v44 = vlaneseq }
  0x1e   :  { %128 = vmatprep.mubr.f32.mxu0 %v524_v0  ;;  %205 = vmatprep.mubr.f32.mxu1 %v524_v0  ;;  %v572_v3 = vld [vmem:[#allocation2 + $0x8] sm:$0xff]  ;;  %v48_v4 = vld [vmem:[%s627_s1] sm:$0xf]  ;;  %v55_v5 = vcombine.high %v570_v2, %v570_v2  ;;  %vm56_vm1 = vcmask 31744   ;;  %v526_v7 = vmov 0   ;;  %s527_s1 = smov 17  }
  0x1f   :  { %437 = vset.pattern.permute.xlu0 %v525_v1  ;;  %v136_v6 = vcombine.high %v572_v3, %v572_v3  ;;  %438 = vset.pattern.permute.xlu1 %v526_v7  ;;  %s528_s3 = smov 15   ;;  %s529_s30 = smov 1   ;;  %v356_v39 = vld [vmem:[%s628_s2] sm:$0xff]  ;;  %v594_v47 = vand.u32 127, %v247_v44  ;;  %v239_v50 = vld [vmem:[#allocation5 + $0x40] sm:$0xff]  ;;  %v240_v51 = vld [vmem:[#allocation5 + $0x48] sm:$0xff] }
  0x20   :  { %51 = vperm.xlu0 %437, %v48_v4   ;;  %414 = vmatprep.subr.msk.mxu0 %vm59_vm0, %v55_v5  ;;  %s530_s5 = smov 127   ;;  %s531_s6 = smov 113   ;;  %v252_v52 = vld [vmem:[#allocation5] sm:$0xff]  ;;  %v253_v53 = vld [vmem:[#allocation5 + $0x8] sm:$0xff]  ;;  %v266_v56 = vld [vmem:[#allocation5 + $0x10] sm:$0xff] }
  0x21   :  { %417 = vmatprep.subr.msk.mxu1 %vm59_vm0, %v136_v6  ;;  %415 = vmatpush1.msk.msra.mxu0 %vm59_vm0, %v570_v2  ;;  %s532_s7 = smov 112   ;;  %s533_s8 = smov 111   ;;  %vm262_vm2 = vcmp.lt.s32.totalorder %v594_v47, 16  ;;  %vm249_vm3 = vcmp.lt.s32.totalorder %v594_v47, 17  ;;  %vm276_vm4 = vcmp.lt.s32.totalorder %v594_v47, 15  ;;  %vm290_vm5 = vcmp.lt.s32.totalorder %v594_v47, 1 }
  0x22   :  { %418 = vmatpush1.msk.msra.mxu1 %vm59_vm0, %v572_v3  ;;  %416 = vmatmul.mubr.msk.f32.vlgmr.msra.gmra.mxu0 %vm56_vm1, %v48_v4  ;;  %v267_v57 = vld [vmem:[#allocation5 + $0x18] sm:$0xff]  ;;  %v281_v5 = vld [vmem:[#allocation5 + $0x28] sm:$0xff]  ;;  %vm304_vm6 = vcmp.lt.s32.totalorder %v594_v47, 127  ;;  %vm318_vm7 = vcmp.lt.s32.totalorder %v594_v47, 113  ;;  %vm332_vm8 = vcmp.lt.s32.totalorder %v594_v47, 112  ;;  %v336_v44 = vld [vmem:[#allocation5 + $0x70] sm:$0xff] }
  0x23   :  { %419 = vmatmul.mubr.msk.f32.vlgmr.msra.gmra.mxu1 %vm56_vm1, %v48_v4  ;;  %v280_v4 = vld [vmem:[#allocation5 + $0x20] sm:$0xff]  ;;  %vm346_vm9 = vcmp.lt.s32.totalorder %v594_v47, 111  ;;  %s534_s2 = smov [#allocation7]  }
  0x24   :  { %439 = vset.pattern.permute.xlu0 %v526_v7  ;;  %s401_s11 = sshll.u32 %s534_s2, 4  ;;  %s402_s11 = int_to_ptr.vmem [resolvable:$true] %s401_s11 }
  0x25   :  { %s492_s12 = scalar_lea.vmem %s402_s11, 256  ;;  %p497_p11 = scmp.lt.s32.totalorder %s402_s11, %s402_s11 }
  0x26   :  { %p493_p10 = scmp.ne.s32.totalorder %s402_s11, %s492_s12  ;;  %p498_p12 = scmp.lt.s32.totalorder %s492_s12, %s492_s12 }
  0x28   :  { %p499_p13 = por %p498_p12, %p497_p11 }
  0x2a   :  { %p500_p0 = pnand %p499_p13, %p493_p10 }
  0x9b   :  { %v52_v8 = vpop.permute.xlu0 %51 }
  0xe2   :  { %v130_v9 = vpop.f32.mrf.mxu0 }
  0xe3   :  { %v207_v10 = vpop.f32.mrf.mxu1  ;;  %v131_v14 = vadd.f32 %v130_v9, %v52_v8 }
  0xe4   :  { %v208_v11 = vadd.f32 %v207_v10, %v52_v8  ;;  %v132_v12 = vpop.f32.mrf.mxu0 }
  0xe5   :  { %v209_v13 = vpop.f32.mrf.mxu1  ;;  %v133_v18 = vadd.f32 %v132_v12, %v52_v8 }
  0xe6   :  { %v214_v15 = vrot.slane %v208_v11, 4  ;;  %v210_v16 = vadd.f32 %v209_v13, %v52_v8 }
  0xe8   :  { %v218_v17 = vsel %vm59_vm0, %v131_v14, %v214_v15  ;;  %v215_v19 = vrot.slane %v210_v16, 4  ;;  %v294_v14 = vld [vmem:[#allocation5 + $0x30] sm:$0xff]  ;;  %v295_v15 = vld [vmem:[#allocation5 + $0x38] sm:$0xff] }
  0xe9   :  { %v222_v20 = vmul.f32 0.044715, %v218_v17  ;;  %v220_v32 = vmul.f32 0.5, %v218_v17 }
  0xea   :  { %v219_v21 = vsel %vm59_vm0, %v133_v18, %v215_v19 }
  0xeb   :  { %v224_v22 = vmul.f32 %v222_v20, %v218_v17  ;;  %v223_v23 = vmul.f32 0.044715, %v219_v21  ;;  %v221_v37 = vmul.f32 0.5, %v219_v21 }
  0xed   :  { %v226_v24 = vmul.f32 %v224_v22, %v218_v17  ;;  %v225_v25 = vmul.f32 %v223_v23, %v219_v21  ;;  %v308_v22 = vld [vmem:[#allocation5 + $0x50] sm:$0xff]  ;;  %v309_v23 = vld [vmem:[#allocation5 + $0x58] sm:$0xff] }
  0xef   :  { %v228_v26 = vadd.f32 %v226_v24, %v218_v17  ;;  %v227_v27 = vmul.f32 %v225_v25, %v219_v21 }
  0xf1   :  { %v230_v28 = vmul.f32 0.7978846, %v228_v26  ;;  %v229_v29 = vadd.f32 %v227_v27, %v219_v21 }
  0xf3   :  { %444 = vtanh.f32 %v230_v28  ;;  %v231_v30 = vmul.f32 0.7978846, %v229_v29 }
  0xf5   :  { %446 = vtanh.f32 %v231_v30 }
 0x100   :  { %v445_v31 = vpop.eup %444 }
 0x101   :  { %v234_v33 = vadd.f32 1.0, %v445_v31 }
 0x102   :  { %v447_v34 = vpop.eup %446 }
 0x103   :  { %v236_v35 = vmul.f32 %v234_v33, %v220_v32  ;;  %v235_v36 = vadd.f32 1.0, %v447_v34 }
 0x105   :  { %258 = vrot.lane.b32.xlu1 %v236_v35, %s523_s26  ;;  %243 = vrot.lane.b32.xlu0 %v236_v35, %s527_s1  ;;  %v237_v38 = vmul.f32 %v235_v36, %v221_v37  ;;  %v241_v63 = vmul.f32 %v239_v50, %v236_v35  ;;  %v322_v36 = vld [vmem:[#allocation5 + $0x60] sm:$0xff]  ;;  %v323_v37 = vld [vmem:[#allocation5 + $0x68] sm:$0xff] }
 0x107   :  { %v242_v62 = vmul.f32 %v240_v51, %v237_v38 }
 0x109   :  { %272 = vrot.lane.b32.xlu1 %v236_v35, %s528_s3  ;;  %260 = vrot.lane.b32.xlu0 %v237_v38, %s523_s26 }
 0x10d   :  { %286 = vrot.lane.b32.xlu1 %v236_v35, %s529_s30  ;;  %274 = vrot.lane.b32.xlu0 %v237_v38, %s528_s3 }
 0x111   :  { %300 = vrot.lane.b32.xlu1 %v236_v35, %s530_s5  ;;  %288 = vrot.lane.b32.xlu0 %v237_v38, %s529_s30 }
 0x115   :  { %245 = vrot.lane.b32.xlu1 %v237_v38, %s527_s1  ;;  %302 = vrot.lane.b32.xlu0 %v237_v38, %s530_s5 }
 0x119   :  { %314 = vrot.lane.b32.xlu1 %v236_v35, %s531_s6  ;;  %316 = vrot.lane.b32.xlu0 %v237_v38, %s531_s6 }
 0x11d   :  { %328 = vrot.lane.b32.xlu1 %v236_v35, %s532_s7  ;;  %330 = vrot.lane.b32.xlu0 %v237_v38, %s532_s7 }
 0x121   :  { %342 = vrot.lane.b32.xlu1 %v236_v35, %s533_s8  ;;  %344 = vrot.lane.b32.xlu0 %v237_v38, %s533_s8 }
 0x125   :  { %359 = vperm.xlu1 %438, %v356_v39  }
 0x177   :  { %v259_v40 = vpop.permute.xlu1 %258  ;;  %v244_v41 = vpop.permute.xlu0 %243 }
 0x17b   :  { %v273_v42 = vpop.permute.xlu1 %272  ;;  %v261_v43 = vpop.permute.xlu0 %260 }
 0x17c   :  { %v263_v58 = vsel %vm262_vm2, %v259_v40, %v261_v43  ;;  %v264_v59 = vsel %vm262_vm2, %v261_v43, %v259_v40 }
 0x17d   :  { %v268_v8 = vmul.f32 %v266_v56, %v264_v59  ;;  %v269_v9 = vmul.f32 %v267_v57, %v263_v58  ;;  %v351_v56 = vld [vmem:[#allocation5 + $0x88] sm:$0xff] }
 0x17f   :  { %v287_v45 = vpop.permute.xlu1 %286  ;;  %v275_v46 = vpop.permute.xlu0 %274 }
 0x180   :  { %v277_v6 = vsel %vm276_vm4, %v273_v42, %v275_v46  ;;  %v278_v7 = vsel %vm276_vm4, %v275_v46, %v273_v42 }
 0x181   :  { %v282_v18 = vmul.f32 %v280_v4, %v278_v7  ;;  %v283_v19 = vmul.f32 %v281_v5, %v277_v6 }
 0x183   :  { %v301_v48 = vpop.permute.xlu1 %300  ;;  %v289_v49 = vpop.permute.xlu0 %288 }
 0x184   :  { %v291_v16 = vsel %vm290_vm5, %v287_v45, %v289_v49  ;;  %v292_v17 = vsel %vm290_vm5, %v289_v49, %v287_v45  ;;  %v337_v45 = vld [vmem:[#allocation5 + $0x78] sm:$0xff] }
 0x185   :  { %v296_v26 = vmul.f32 %v294_v14, %v292_v17  ;;  %v297_v27 = vmul.f32 %v295_v15, %v291_v16 }
 0x187   :  { %v246_v54 = vpop.permute.xlu1 %245  ;;  %v303_v55 = vpop.permute.xlu0 %302 }
 0x188   :  { %v250_v60 = vsel %vm249_vm3, %v244_v41, %v246_v54  ;;  %v251_v61 = vsel %vm249_vm3, %v246_v54, %v244_v41  ;;  %v305_v24 = vsel %vm304_vm6, %v301_v48, %v303_v55  ;;  %v306_v25 = vsel %vm304_vm6, %v303_v55, %v301_v48  ;;  %v350_v55 = vld [vmem:[#allocation5 + $0x80] sm:$0xff] }
 0x189   :  { %v254_v0 = vmul.f32 %v252_v52, %v251_v61  ;;  %v255_v1 = vmul.f32 %v253_v53, %v250_v60  ;;  %v310_v32 = vmul.f32 %v308_v22, %v305_v24  ;;  %v311_v33 = vmul.f32 %v309_v23, %v306_v25 }
 0x18b   :  { %v256_v10 = vadd.f32 %v254_v0, %v241_v63  ;;  %v257_v11 = vadd.f32 %v255_v1, %v242_v62  ;;  %v315_v12 = vpop.permute.xlu1 %314  ;;  %v317_v13 = vpop.permute.xlu0 %316  ;;  %v364_v63 = vcombine.low %v570_v2, %v572_v3  ;;  %v365_v0 = vcombine.high %v570_v2, %v572_v3 }
 0x18c   :  { %v319_v38 = vsel %vm318_vm7, %v315_v12, %v317_v13  ;;  %v320_v39 = vsel %vm318_vm7, %v317_v13, %v315_v12 }
 0x18d   :  { %v270_v20 = vadd.f32 %v268_v8, %v256_v10  ;;  %v271_v21 = vadd.f32 %v269_v9, %v257_v11  ;;  %v324_v42 = vmul.f32 %v322_v36, %v319_v38  ;;  %v325_v43 = vmul.f32 %v323_v37, %v320_v39 }
 0x18f   :  { %v285_v28 = vadd.f32 %v283_v19, %v271_v21  ;;  %v284_v29 = vadd.f32 %v282_v18, %v270_v20  ;;  %v329_v34 = vpop.permute.xlu1 %328  ;;  %v331_v35 = vpop.permute.xlu0 %330 }
 0x190   :  { %v333_v46 = vsel %vm332_vm8, %v329_v34, %v331_v35  ;;  %v334_v48 = vsel %vm332_vm8, %v331_v35, %v329_v34 }
 0x191   :  { %v299_v30 = vadd.f32 %v297_v27, %v285_v28  ;;  %v298_v31 = vadd.f32 %v296_v26, %v284_v29  ;;  %v338_v53 = vmul.f32 %v336_v44, %v333_v46  ;;  %v339_v54 = vmul.f32 %v337_v45, %v334_v48 }
 0x193   :  { %v312_v40 = vadd.f32 %v310_v32, %v298_v31  ;;  %v313_v41 = vadd.f32 %v311_v33, %v299_v30  ;;  %v343_v51 = vpop.permute.xlu1 %342  ;;  %v345_v52 = vpop.permute.xlu0 %344 }
 0x194   :  { %v347_v57 = vsel %vm346_vm9, %v343_v51, %v345_v52  ;;  %v348_v58 = vsel %vm346_vm9, %v345_v52, %v343_v51 }
 0x195   :  { %v326_v49 = vadd.f32 %v324_v42, %v312_v40  ;;  %v327_v50 = vadd.f32 %v325_v43, %v313_v41  ;;  %v352_v61 = vmul.f32 %v350_v55, %v347_v57  ;;  %v353_v62 = vmul.f32 %v351_v56, %v348_v58 }
 0x197   :  { %v340_v59 = vadd.f32 %v338_v53, %v326_v49  ;;  %v341_v60 = vadd.f32 %v339_v54, %v327_v50 }
 0x199   :  { %v354_v1 = vadd.f32 %v352_v61, %v340_v59  ;;  %v355_v4 = vadd.f32 %v353_v62, %v341_v60 }
 0x1a0   :  { %v360_v47 = vpop.permute.xlu1 %359 }
 0x1a1   :  { %v362_v5 = vadd.f32 %v360_v47, %v354_v1  ;;  %v363_v6 = vadd.f32 %v360_v47, %v355_v4 }
 0x1a3   :  { %v368_v7 = vadd.f32 %v364_v63, %v362_v5  ;;  %v369_v8 = vadd.f32 %v365_v0, %v363_v6 }
 0x1a5   :  { %v372_v9 = vmul.f32 0.044715, %v368_v7  ;;  %v373_v10 = vmul.f32 0.044715, %v369_v8  ;;  %v370_v19 = vmul.f32 0.5, %v368_v7  ;;  %v371_v21 = vmul.f32 0.5, %v369_v8 }
 0x1a7   :  { %v374_v11 = vmul.f32 %v372_v9, %v368_v7  ;;  %v375_v12 = vmul.f32 %v373_v10, %v369_v8 }
 0x1a9   :  { %v376_v13 = vmul.f32 %v374_v11, %v368_v7  ;;  %v377_v14 = vmul.f32 %v375_v12, %v369_v8 }
 0x1ab   :  { %v378_v15 = vadd.f32 %v376_v13, %v368_v7  ;;  %v379_v16 = vadd.f32 %v377_v14, %v369_v8 }
 0x1ad   :  { %v380_v17 = vmul.f32 0.7978846, %v378_v15  ;;  %v381_v18 = vmul.f32 0.7978846, %v379_v16 }
 0x1af   :  { %448 = vtanh.f32 %v380_v17 }
 0x1b0   :  { %450 = vtanh.f32 %v381_v18 }
 0x1bc   :  { %v449_v2 = vpop.eup %448 }
 0x1bd   :  { %v451_v3 = vpop.eup %450  ;;  %v384_v20 = vadd.f32 1.0, %v449_v2 }
 0x1be   :  { %v385_v22 = vadd.f32 1.0, %v451_v3 }
 0x1bf   :  { %v386_v23 = vmul.f32 %v384_v20, %v370_v19 }
 0x1c0   :  { %v387_v24 = vmul.f32 %v385_v22, %v371_v21 }
 0x1c2   :  { %v390_v25 = vcombine.low %v386_v23, %v387_v24  ;;  %v391_v26 = vcombine.high %v386_v23, %v387_v24 }
 0x1c4   :  { %394 = vst [vmem:[#allocation7] sm:$0xff] %v390_v25  ;;  %395 = vst [vmem:[#allocation7 + $0x8] sm:$0xff] %v391_v26 }
 0x1c5   :  { %503 = shalt.err (!%p500_p0)
}
 0x1c6   :  { %407 = dma.vmem_to_hbm [thread:$0]  %s402_s11, 256, %s630_s4, [#allocation4], %s519_s18, %s519_s18, %s520_s19  }
 0x1c7   :  { %516 = dma.done.wait [#allocation4], 256  }
 0x1c8   :  { %517 = vsyncadd [#allocation4], 4294967040 }
 0x1c9   :  { %411 = vsyncpa [#allocation3], 1 }
 0x1ca   :  { %412 = vsyncpa [#allocation6], 1 }
 0x1cb   :  { %413 = vsyncpa [#allocation4], 1 }

</bundles_post_ra>
